<compile_context>
chip_gen: v7x
topology: tpu7x:2x2x1
jax: 0.10.0
libtpu: 0.0.40
codegen_flags: <defaults>
</compile_context>

<pallas_src>
import jax
import jax.numpy as jnp
from jax import lax
from jax.experimental import pallas as pl
from jax.experimental.pallas import tpu as pltpu


def _round_up(n: int, m: int) -> int:
    return ((n + m - 1) // m) * m


def _cdiv(a: int, b: int) -> int:
    return -(-a // b)


def _vmem_capacity_bytes() -> int:
    """Per-core VMEM capacity; conservative 64 MiB (v7x) fallback."""
    try:
        info = pltpu.get_tpu_info()
        cap = int(getattr(info, "vmem_capacity_bytes", 0) or 0)
        if cap > 0:
            return cap
    except Exception:
        pass
    return 64 * 1024 * 1024


def simplenet_kernel(x_ref, w1_ref, b1_ref, w2_ref, b2_ref, o_ref):
    # Layer 1 on the MXU: (TILE_B, 45) @ (45, 10) -> (TILE_B, 10), f32 accumulate.
    x = x_ref[...]
    h = jnp.dot(x, w1_ref[...], preferred_element_type=jnp.float32)
    h = jnp.maximum(h + b1_ref[...], 0.0)                      # bias + ReLU (VPU)

    # Layer 2: contract the hidden dim of both operands (A @ B^T form) so the
    # result comes out lane-dense as (1, TILE_B) — no (TILE_B, 1) column store.
    y = lax.dot_general(
        w2_ref[...], h,                                        # (1, 10) x (TILE_B, 10)
        dimension_numbers=(((1,), (1,)), ((), ())),
        preferred_element_type=jnp.float32,
    )                                                          # -> (1, TILE_B)
    o_ref[...] = (y + b2_ref[...]).astype(o_ref.dtype)


def simplenet_forward(x, w1, b1, w2, b2, *, tile_b=None, compute_dtype=None):
    """x: (B, 45) f32. w1: (45, 10), b1: (1, 10), w2: (1, 10) (PyTorch layout), b2: (1, 1).

    compute_dtype: optionally jnp.bfloat16 to stream x/w1 at half the HBM bytes
    (f32 MXU accumulation, f32 bias/ReLU/output).
    """
    B, F = x.shape
    assert F == 45 and w1.shape == (45, 10) and w2.shape == (1, 10)

    if compute_dtype is not None and compute_dtype != x.dtype:
        x = x.astype(compute_dtype)
        w1 = w1.astype(compute_dtype)

    b128 = _round_up(B, 128)
    vmem_bytes = _vmem_capacity_bytes()

    # VMEM cost per batch-row of a tile: x block lane-padded 45->128 (512 B/row)
    # and the (1, tile_b) output block sublane-padded 1->8 (32 B/row), each
    # double-buffered by the default pipeline.
    x_row_bytes = 128 * jnp.dtype(x.dtype).itemsize
    bytes_per_row = 2 * x_row_bytes + 2 * 8 * 4

    if tile_b is None:
        budget = vmem_bytes // 2                      # ~half of VMEM for streamed tiles
        cap = max(128, (budget // bytes_per_row) // 128 * 128)
        cap = min(cap, 65536)
        n_steps = _cdiv(b128, cap)
        # Multi-step grids: keep the step count even so the "parallel" batch axis
        # feeds both v7x TensorCores evenly (harmless no-op on v5e/v6e).
        if n_steps > 1 and n_steps % 2:
            n_steps += 1
        tile_b = _round_up(_cdiv(b128, n_steps), 128)
    else:
        assert tile_b % 128 == 0
        n_steps = _cdiv(b128, tile_b)

    b_out = n_steps * tile_b                          # output padded to exact blocks;
                                                      # x itself is NOT padded (masked
                                                      # OOB reads handle the tail block)

    needed = tile_b * bytes_per_row + (1 << 20)       # tiles + resident weights/scratch
    vmem_limit = max(32 << 20, min(vmem_bytes * 3 // 4, needed + (16 << 20)))

    # Advisory cost: ~920 flops and ~180 B read + 4 B written per row.
    itemsize = jnp.dtype(x.dtype).itemsize
    flops = B * (2 * 45 * 10 + 10 + 2 * 10)
    bytes_accessed = (B * 45 * itemsize + B * 4
                      + w1.size * itemsize + (b1.size + w2.size + b2.size) * 4)
    cost = pl.CostEstimate(flops=flops, transcendentals=0,
                           bytes_accessed=bytes_accessed)

    out = pl.pallas_call(
        simplenet_kernel,
        out_shape=jax.ShapeDtypeStruct((1, b_out), jnp.float32),
        grid=(n_steps,),
        in_specs=[
            pl.BlockSpec((tile_b, 45), lambda i: (i, 0)),   # streamed batch tile
            pl.BlockSpec((45, 10), lambda i: (0, 0)),       # resident weights / biases
            pl.BlockSpec((1, 10), lambda i: (0, 0)),
            pl.BlockSpec((1, 10), lambda i: (0, 0)),
            pl.BlockSpec((1, 1), lambda i: (0, 0)),
        ],
        out_specs=pl.BlockSpec((1, tile_b), lambda i: (0, i)),  # lane-dense output slab
        compiler_params=pltpu.CompilerParams(
            dimension_semantics=("parallel",),
            vmem_limit_bytes=int(vmem_limit),
        ),
        cost_estimate=cost,
    )(x, w1, b1, w2, b2)

    return out[0, :B].reshape(B, 1)


def init_params(key):
    # nn.Linear default init: U(-1/sqrt(fan_in), 1/sqrt(fan_in)).
    k1, k2, k3, k4 = jax.random.split(key, 4)
    bound1 = 1.0 / jnp.sqrt(jnp.float32(45))
    bound2 = 1.0 / jnp.sqrt(jnp.float32(10))
    w1 = jax.random.uniform(k1, (45, 10), jnp.float32, -bound1, bound1)  # (in, out)
    b1 = jax.random.uniform(k2, (1, 10), jnp.float32, -bound1, bound1)
    w2 = jax.random.uniform(k3, (1, 10), jnp.float32, -bound2, bound2)   # (out, in) = PyTorch layout
    b2 = jax.random.uniform(k4, (1, 1), jnp.float32, -bound2, bound2)
    return w1, b1, w2, b2


def reference(x, w1, b1, w2, b2):
    h = jnp.maximum(x @ w1 + b1, 0.0)
    return h @ w2.T + b2


if __name__ == "__main__":
    key = jax.random.PRNGKey(0)
    kx, kx2, kx3, kp = jax.random.split(key, 4)
    w1, b1, w2, b2 = init_params(kp)

    # Small batch (8 rows -> single 128-row tile; tail of the input block is a
    # masked out-of-bounds read, no jnp.pad copy of x).
    x = jax.random.normal(kx, (8, 45), jnp.float32)
    out = jax.block_until_ready(simplenet_forward(x, w1, b1, w2, b2))
    assert out.shape == (8, 1)
    assert jnp.allclose(out, reference(x, w1, b1, w2, b2), atol=1e-5, rtol=1e-5)

    # Multi-step grid: non-multiple batch with a forced small tile (grid of 3).
    # Exercises resident-weight index maps, streamed x tiles, the lane-dense
    # output slab, and masked OOB tail reads.
    x2 = jax.random.normal(kx2, (300, 45), jnp.float32)
    out2 = jax.block_until_ready(simplenet_forward(x2, w1, b1, w2, b2, tile_b=128))
    assert out2.shape == (300, 1)
    assert jnp.allclose(out2, reference(x2, w1, b1, w2, b2), atol=1e-5, rtol=1e-5)

    # Optional bf16 streaming path (halves the dominant HBM read of x); f32
    # accumulation keeps the error small, checked against the f32 reference.
    x3 = jax.random.normal(kx3, (512, 45), jnp.float32)
    out3 = jax.block_until_ready(
        simplenet_forward(x3, w1, b1, w2, b2, compute_dtype=jnp.bfloat16))
    assert out3.shape == (512, 1)
    assert jnp.allclose(out3, reference(x3, w1, b1, w2, b2), atol=5e-2, rtol=5e-2)

    print("KERNEL_OK")
</pallas_src>

<mosaic_0001>
module attributes {stable_mosaic.version = 11 : i64} {
  func.func @simplenet_kernel(%arg0: i32, %arg1: memref<128x45xf32, #tpu.memory_space<vmem>>, %arg2: memref<45x10xf32, #tpu.memory_space<vmem>>, %arg3: memref<1x10xf32, #tpu.memory_space<vmem>>, %arg4: memref<1x10xf32, #tpu.memory_space<vmem>>, %arg5: memref<1x1xf32, #tpu.memory_space<vmem>>, %arg6: memref<1x128xf32, #tpu.memory_space<vmem>>) attributes {dimension_semantics = [#tpu.dimension_semantics<parallel>], iteration_bounds = array<i64: 1>, scalar_prefetch = 0 : i64, scratch_operands = 0 : i64, tpu.core_type = #tpu.core_type<tc>, window_params = [{transform_indices = @transform_0, window_bounds = array<i64: 128, 45>}, {pipeline_mode = #tpu.pipeline_mode<synchronous>, transform_indices = @transform_1, window_bounds = array<i64: 45, 10>}, {pipeline_mode = #tpu.pipeline_mode<synchronous>, transform_indices = @transform_2, window_bounds = array<i64: 1, 10>}, {pipeline_mode = #tpu.pipeline_mode<synchronous>, transform_indices = @transform_3, window_bounds = array<i64: 1, 10>}, {pipeline_mode = #tpu.pipeline_mode<synchronous>, transform_indices = @transform_4, window_bounds = array<i64: 1, 1>}, {transform_indices = @transform_5, window_bounds = array<i64: 1, 128>}]} {
    %c0 = arith.constant 0 : index
    %c0_0 = arith.constant 0 : index
    %0 = vector.load %arg1[%c0, %c0_0] : memref<128x45xf32, #tpu.memory_space<vmem>>, vector<128x45xf32>
    %c0_1 = arith.constant 0 : index
    %c0_2 = arith.constant 0 : index
    %1 = vector.load %arg2[%c0_1, %c0_2] : memref<45x10xf32, #tpu.memory_space<vmem>>, vector<45x10xf32>
    %cst = arith.constant dense<0.000000e+00> : vector<128x10xf32>
    %2 = tpu.matmul %0, %1, %cst {dimension_numbers = #tpu.dot_dimension_numbers<[1], [0], [0], [1], [0, 0, 1, 1], [], []>} : vector<128x45xf32>, vector<45x10xf32>, vector<128x10xf32> -> vector<128x10xf32>
    %c0_3 = arith.constant 0 : index
    %c0_4 = arith.constant 0 : index
    %3 = vector.load %arg3[%c0_3, %c0_4] : memref<1x10xf32, #tpu.memory_space<vmem>>, vector<1x10xf32>
    %4 = vector.broadcast %3 : vector<1x10xf32> to vector<128x10xf32>
    %5 = arith.addf %2, %4 : vector<128x10xf32>
    %cst_5 = arith.constant 0.000000e+00 : f32
    %6 = vector.broadcast %cst_5 : f32 to vector<128x10xf32>
    %7 = arith.maximumf %5, %6 : vector<128x10xf32>
    %c0_6 = arith.constant 0 : index
    %c0_7 = arith.constant 0 : index
    %8 = vector.load %arg4[%c0_6, %c0_7] : memref<1x10xf32, #tpu.memory_space<vmem>>, vector<1x10xf32>
    %cst_8 = arith.constant dense<0.000000e+00> : vector<1x128xf32>
    %9 = tpu.matmul %8, %7, %cst_8 {dimension_numbers = #tpu.dot_dimension_numbers<[1], [1], [0], [0], [0, 0, 1, 0], [], []>} : vector<1x10xf32>, vector<128x10xf32>, vector<1x128xf32> -> vector<1x128xf32>
    %c0_9 = arith.constant 0 : index
    %c0_10 = arith.constant 0 : index
    %10 = vector.load %arg5[%c0_9, %c0_10] : memref<1x1xf32, #tpu.memory_space<vmem>>, vector<1x1xf32>
    %11 = vector.broadcast %10 : vector<1x1xf32> to vector<1x128xf32>
    %12 = arith.addf %9, %11 : vector<1x128xf32>
    %c0_11 = arith.constant 0 : index
    %c0_12 = arith.constant 0 : index
    %13 = vector.load %arg6[%c0_11, %c0_12] : memref<1x128xf32, #tpu.memory_space<vmem>>, vector<1x128xf32>
    tpu.vector_store %arg6[%c0_11, %c0_12], %12 {strides = array<i32>} : memref<1x128xf32, #tpu.memory_space<vmem>>, vector<1x128xf32>,
    return
  }
  func.func @transform_0(%arg0: i32) -> (i32, i32) {
    %c0_i32 = arith.constant 0 : i32
    %c0_i32_0 = arith.constant 0 : i32
    return %arg0, %c0_i32 : i32, i32
  }
  func.func @transform_1(%arg0: i32) -> (i32, i32) {
    %c0_i32 = arith.constant 0 : i32
    %c0_i32_0 = arith.constant 0 : i32
    %c0_i32_1 = arith.constant 0 : i32
    return %c0_i32, %c0_i32_0 : i32, i32
  }
  func.func @transform_2(%arg0: i32) -> (i32, i32) {
    %c0_i32 = arith.constant 0 : i32
    %c0_i32_0 = arith.constant 0 : i32
    %c0_i32_1 = arith.constant 0 : i32
    return %c0_i32, %c0_i32_0 : i32, i32
  }
  func.func @transform_3(%arg0: i32) -> (i32, i32) {
    %c0_i32 = arith.constant 0 : i32
    %c0_i32_0 = arith.constant 0 : i32
    %c0_i32_1 = arith.constant 0 : i32
    return %c0_i32, %c0_i32_0 : i32, i32
  }
  func.func @transform_4(%arg0: i32) -> (i32, i32) {
    %c0_i32 = arith.constant 0 : i32
    %c0_i32_0 = arith.constant 0 : i32
    %c0_i32_1 = arith.constant 0 : i32
    return %c0_i32, %c0_i32_0 : i32, i32
  }
  func.func @transform_5(%arg0: i32) -> (i32, i32) {
    %c0_i32 = arith.constant 0 : i32
    %c0_i32_0 = arith.constant 0 : i32
    return %c0_i32, %arg0 : i32, i32
  }
}

</mosaic_0001>

<bundles_post_ra>
// kernel: tpu_custom_call.1
= control target key start
LH: loop header
LB: loop body
LE: loop exit
PB: predicated region body
PF: predicated region fallthrough
CT: control target
= control target key end

     0   :  { %s806_s0 = inlined_call_operand.vmem [shape: f32[8,45], index: 0, kind: input, shape index: {}]   ;;  %s807_s1 = inlined_call_operand.vmem [shape: f32[45,10], index: 1, kind: input, shape index: {}]   ;;  %s808_s2 = inlined_call_operand.vmem [shape: f32[1,10], index: 2, kind: input, shape index: {}]   ;;  %s809_s3 = inlined_call_operand.vmem [shape: f32[1,10], index: 3, kind: input, shape index: {}]   ;;  %s810_s4 = inlined_call_operand.<no memory space> [shape: f32[1,1], index: 4, kind: input, shape index: {}]   ;;  %s811_s5 = inlined_call_operand.hbm [shape: f32[1,128], index: 5, kind: output, shape index: {}]  }
   0x1   :  { %v10_v0 = vstv %s810_s4 }
   0x2   :  { %11 = vst [vmem:[#allocation2] sm:$0x1] %v10_v0 }
   0x3   :  { %v39_v1 = vld [vmem:[%s807_s1] sm:$0xff]  ;;  %v40_v2 = vld [vmem:[%s807_s1 + $0x8] sm:$0xff]  ;;  %v41_v3 = vld [vmem:[%s807_s1 + $0x10] sm:$0xff]  ;;  %vm52_vm0 = vcmask 367616   ;;  %vm101_vm1 = vcmask 1044480   ;;  %vm636_vm2 = vmmov 1  }
   0x4   :  { %v559_v4 = vpack.c.bf16 %v40_v2, %v39_v1  ;;  %v42_v5 = vld [vmem:[%s807_s1 + $0x18] sm:$0xff]  ;;  %v43_v7 = vld [vmem:[%s807_s1 + $0x20] sm:$0xff]  ;;  %v44_v8 = vld [vmem:[%s807_s1 + $0x28] sm:$0x1f] }
   0x5   :  { %v563_v6 = vpack.c.bf16 %v42_v5, %v41_v3  ;;  %v23_v9 = vld [vmem:[%s806_s0] sm:$0xff]  ;;  %v567_v10 = vpack.c.bf16 %v44_v8, %v43_v7  ;;  %vm568_vm3 = vmpackc.low %vm101_vm1, %vm636_vm2 }
   0x6   :  { %560 = vmatprep.subr.bf16.mxu0 %v559_v4  ;;  %500 = vmatprep.mubr.msk.f32.mxu0 %vm52_vm0, %v23_v9 }
   0x7   :  { %562 = vmatpush3.bf16.msra.mxu0 %v559_v4 }
   0x8   :  { %564 = vmatprep.subr.bf16.mxu0 %v563_v6 }
   0x9   :  { %12 = vsyncpa [#allocation4], 0  ;;  %v24_v11 = vld [vmem:[%s806_s0 + $0x8] sm:$0xff]  ;;  %v25_v12 = vld [vmem:[%s806_s0 + $0x10] sm:$0xff]  ;;  %v637_v26 = vmov 0.0|0.0   ;;  %vm638_vm4 = vmmov 0  }
   0xa   :  { %v26_v13 = vld [vmem:[%s806_s0 + $0x18] sm:$0xff]  ;;  %v27_v14 = vld [vmem:[%s806_s0 + $0x20] sm:$0xff]  ;;  %v28_v15 = vld [vmem:[%s806_s0 + $0x28] sm:$0xff]  ;;  %573 = vmatprep.subr.bf16.mxu1 %v637_v26  ;;  %v639_v27 = vmov 0.0   ;;  %v640_v29 = vmov 0   ;;  %vm277_vm5 = vcmask 80896  }
   0xb   :  { %566 = vmatpush3.bf16.msra.mxu0 %v563_v6  ;;  %v29_v16 = vld [vmem:[%s806_s0 + $0x30] sm:$0xff]  ;;  %v30_v17 = vld [vmem:[%s806_s0 + $0x38] sm:$0xff]  ;;  %v31_v18 = vld [vmem:[%s806_s0 + $0x40] sm:$0xff]  ;;  %556 = vmatprep.mubr.msk.f32.mxu1 %vm638_vm4, %v639_v27  ;;  %s641_s12 = smov [#allocation3]  }
   0xc   :  { %569 = vmatprep.subr.msk.bf16.mxu0 %vm568_vm3, %v567_v10  ;;  %v32_v19 = vld [vmem:[%s806_s0 + $0x48] sm:$0xff]  ;;  %v33_v20 = vld [vmem:[%s806_s0 + $0x50] sm:$0xff]  ;;  %v34_v21 = vld [vmem:[%s806_s0 + $0x58] sm:$0xff]  ;;  %611 = vset.pattern.permute.xlu0 %v640_v29  ;;  %s406_s13 = sshll.u32 %s641_s12, 4  ;;  %s407_s13 = int_to_ptr.vmem [resolvable:$true] %s406_s13 }
   0xd   :  { %v35_v22 = vld [vmem:[%s806_s0 + $0x60] sm:$0xff]  ;;  %v36_v23 = vld [vmem:[%s806_s0 + $0x68] sm:$0xff]  ;;  %v37_v24 = vld [vmem:[%s806_s0 + $0x70] sm:$0xff]  ;;  %s612_s14 = scalar_lea.vmem %s407_s13, 16  ;;  %s616_s15 = scalar_lea.vmem %s407_s13, 32 }
   0xe   :  { %v38_v25 = vld [vmem:[%s806_s0 + $0x78] sm:$0xff]  ;;  %v267_v28 = vld [vmem:[#allocation2] sm:$0x1]  ;;  %vm763_vm6 = vmpackc.low %vm277_vm5, %vm277_vm5  ;;  %p613_p0 = scmp.ne.s32.totalorder %s407_s13, %s612_s14  ;;  %p617_p1 = scmp.lt.s32.totalorder %s407_s13, %s407_s13 }
   0xf   :  { %572 = vmatpush3.bf16.msk.msra.mxu0 %vm568_vm3, %v567_v10  ;;  %270 = vperm.xlu0 %611, %v267_v28   ;;  %v414_v30 = vld [vmem:[%s808_s2] ss:$0 sm:$0xff]  ;;  %p618_p2 = scmp.lt.s32.totalorder %s616_s15, %s612_s14 }
  0x11   :  { %p619_p3 = por %p618_p2, %p617_p1 }
  0x12   :  { %501 = vmatmul.mubr.msk.f32.vlgmr.msra.gmra.mrb[0].mxu0 %vm52_vm0, %v24_v11 }
  0x13   :  { %503 = vmatprep.mubr.msk.f32.mxu0 %vm52_vm0, %v25_v12  ;;  %p620_p4 = pnand %p619_p3, %p613_p0 }
  0x16   :  { %504 = vmatmul.mubr.msk.f32.gmra.mrb[2].mxu0 %vm52_vm0, %v26_v13 }
  0x17   :  { %506 = vmatprep.mubr.msk.f32.mxu0 %vm52_vm0, %v27_v14 }
  0x1a   :  { %507 = vmatmul.mubr.msk.f32.gmra.mrb[4].mxu0 %vm52_vm0, %v28_v15 }
  0x1b   :  { %509 = vmatprep.mubr.msk.f32.mxu0 %vm52_vm0, %v29_v16 }
  0x1e   :  { %510 = vmatmul.mubr.msk.f32.gmra.mrb[6].mxu0 %vm52_vm0, %v30_v17 }
  0x1f   :  { %512 = vmatprep.mubr.msk.f32.mxu0 %vm52_vm0, %v31_v18 }
  0x22   :  { %513 = vmatmul.mubr.msk.f32.gmra.mrb[8].mxu0 %vm52_vm0, %v32_v19 }
  0x23   :  { %515 = vmatprep.mubr.msk.f32.mxu0 %vm52_vm0, %v33_v20 }
  0x26   :  { %516 = vmatmul.mubr.msk.f32.gmra.mrb[10].mxu0 %vm52_vm0, %v34_v21 }
  0x27   :  { %518 = vmatprep.mubr.msk.f32.mxu0 %vm52_vm0, %v35_v22 }
  0x2a   :  { %519 = vmatmul.mubr.msk.f32.gmra.mrb[12].mxu0 %vm52_vm0, %v36_v23 }
  0x2b   :  { %521 = vmatprep.mubr.msk.f32.mxu0 %vm52_vm0, %v37_v24  ;;  %v266_v24 = vld [vmem:[%s809_s3] sm:$0x1] }
  0x2e   :  { %522 = vmatmul.mubr.msk.f32.gmra.mrb[14].mxu0 %vm52_vm0, %v38_v25  ;;  %v273_v25 = vlaneseq }
  0x30   :  { %v274_v27 = vshrl.u32 %v273_v25, 7 }
  0x32   :  { %v275_v28 = vsub.s32 0, %v274_v27 }
  0x8e   :  { %v271_v29 = vpop.permute.xlu0 %270 }
  0xe5   :  { %v502_v31 = vpop.f32.mrb[0].mxu0 }
  0xe6   :  { %v177_v32 = vadd.f32 %v502_v31, %v414_v30  ;;  %v171_v33 = vpop.f32.mrb[1].mxu0 }
  0xe7   :  { %v172_v34 = vadd.f32 %v414_v30, %v171_v33 }
  0xe8   :  { %v251_v35 = vmax.f32 %v177_v32, 0.0 }
  0xe9   :  { %v250_v36 = vmax.f32 %v172_v34, 0.0  ;;  %v505_v37 = vpop.f32.mrb[2].mxu0 }
  0xea   :  { %v187_v38 = vadd.f32 %v505_v37, %v414_v30  ;;  %v181_v39 = vpop.f32.mrb[3].mxu0 }
  0xeb   :  { %v574_v41 = vpack.c.bf16 %v251_v35, %v250_v36  ;;  %v182_v42 = vadd.f32 %v414_v30, %v181_v39 }
  0xec   :  { %v253_v43 = vmax.f32 %v187_v38, 0.0 }
  0xed   :  { %v252_v44 = vmax.f32 %v182_v42, 0.0  ;;  %576 = vmatpush3.bf16.xpose.msk.msra.mxu1 %vm763_vm6, %v574_v41  ;;  %v508_v45 = vpop.f32.mrb[4].mxu0 }
  0xee   :  { %v197_v46 = vadd.f32 %v508_v45, %v414_v30  ;;  %577 = vmatprep.subr.bf16.mxu1 %v637_v26  ;;  %v191_v47 = vpop.f32.mrb[5].mxu0 }
  0xef   :  { %v578_v48 = vpack.c.bf16 %v253_v43, %v252_v44  ;;  %v192_v49 = vadd.f32 %v414_v30, %v191_v47 }
  0xf0   :  { %v255_v50 = vmax.f32 %v197_v46, 0.0 }
  0xf1   :  { %v254_v51 = vmax.f32 %v192_v49, 0.0  ;;  %v511_v52 = vpop.f32.mrb[6].mxu0 }
  0xf2   :  { %v207_v53 = vadd.f32 %v511_v52, %v414_v30  ;;  %v201_v54 = vpop.f32.mrb[7].mxu0 }
  0xf3   :  { %v582_v55 = vpack.c.bf16 %v255_v50, %v254_v51  ;;  %v202_v56 = vadd.f32 %v414_v30, %v201_v54 }
  0xf4   :  { %v257_v57 = vmax.f32 %v207_v53, 0.0 }
  0xf5   :  { %580 = vmatpush3.bf16.xpose.msk.msra.mxu1 %vm763_vm6, %v578_v48  ;;  %v256_v58 = vmax.f32 %v202_v56, 0.0  ;;  %v514_v59 = vpop.f32.mrb[8].mxu0 }
  0xf6   :  { %581 = vmatprep.subr.bf16.mxu1 %v637_v26  ;;  %v217_v60 = vadd.f32 %v514_v59, %v414_v30  ;;  %v211_v61 = vpop.f32.mrb[9].mxu0 }
  0xf7   :  { %v586_v62 = vpack.c.bf16 %v257_v57, %v256_v58  ;;  %v212_v63 = vadd.f32 %v414_v30, %v211_v61 }
  0xf8   :  { %v259_v0 = vmax.f32 %v217_v60, 0.0 }
  0xf9   :  { %v258_v1 = vmax.f32 %v212_v63, 0.0  ;;  %v517_v2 = vpop.f32.mrb[10].mxu0 }
  0xfa   :  { %v227_v3 = vadd.f32 %v517_v2, %v414_v30  ;;  %v221_v4 = vpop.f32.mrb[11].mxu0 }
  0xfb   :  { %v590_v5 = vpack.c.bf16 %v259_v0, %v258_v1  ;;  %v222_v6 = vadd.f32 %v414_v30, %v221_v4 }
  0xfc   :  { %v261_v7 = vmax.f32 %v227_v3, 0.0 }
  0xfd   :  { %584 = vmatpush3.bf16.xpose.msk.msra.mxu1 %vm763_vm6, %v582_v55  ;;  %v260_v8 = vmax.f32 %v222_v6, 0.0  ;;  %v520_v9 = vpop.f32.mrb[12].mxu0 }
  0xfe   :  { %585 = vmatprep.subr.bf16.mxu1 %v637_v26  ;;  %v237_v10 = vadd.f32 %v520_v9, %v414_v30  ;;  %v231_v11 = vpop.f32.mrb[13].mxu0 }
  0xff   :  { %v594_v12 = vpack.c.bf16 %v261_v7, %v260_v8  ;;  %v232_v13 = vadd.f32 %v414_v30, %v231_v11 }
 0x100   :  { %v263_v14 = vmax.f32 %v237_v10, 0.0 }
 0x101   :  { %v262_v15 = vmax.f32 %v232_v13, 0.0  ;;  %v523_v16 = vpop.f32.mrb[14].mxu0 }
 0x102   :  { %v247_v17 = vadd.f32 %v523_v16, %v414_v30  ;;  %v241_v18 = vpop.f32.mrb[15].mxu0 }
 0x103   :  { %v598_v19 = vpack.c.bf16 %v263_v14, %v262_v15  ;;  %v242_v20 = vadd.f32 %v414_v30, %v241_v18  ;;  %v276_v30 = vrot.slane %v271_v29, %v275_v28 }
 0x104   :  { %v265_v21 = vmax.f32 %v247_v17, 0.0 }
 0x105   :  { %588 = vmatpush3.bf16.xpose.msk.msra.mxu1 %vm763_vm6, %v586_v62  ;;  %v264_v22 = vmax.f32 %v242_v20, 0.0 }
 0x106   :  { %589 = vmatprep.subr.bf16.mxu1 %v637_v26 }
 0x107   :  { %v602_v23 = vpack.c.bf16 %v265_v21, %v264_v22 }
 0x10d   :  { %592 = vmatpush3.bf16.xpose.msk.msra.mxu1 %vm763_vm6, %v590_v5 }
 0x10e   :  { %593 = vmatprep.subr.bf16.mxu1 %v637_v26 }
 0x115   :  { %596 = vmatpush3.bf16.xpose.msk.msra.mxu1 %vm763_vm6, %v594_v12 }
 0x116   :  { %597 = vmatprep.subr.bf16.mxu1 %v637_v26 }
 0x11d   :  { %600 = vmatpush3.bf16.xpose.msk.msra.mxu1 %vm763_vm6, %v598_v19 }
 0x11e   :  { %601 = vmatprep.subr.bf16.mxu1 %v637_v26 }
 0x125   :  { %604 = vmatpush3.bf16.xpose.msk.msra.mxu1 %vm763_vm6, %v602_v23 }
 0x12c   :  { %557 = vmatmul.mubr.msk.f32.vlgmr.msra.gmra.mrb[0].mxu1 %vm277_vm5, %v266_v24 }
 0x1ff   :  { %v395_v31 = vpop.f32.mrb[0].mxu1 }
 0x200   :  { %v396_v32 = vadd.f32 %v395_v31, %v276_v30  ;;  %v558_v33 = vpop.f32.mrb[1].mxu1 }
 0x202   :  { %399 = vst [vmem:[#allocation3] sm:$0x1] %v396_v32 }
 0x203   :  { %623 = shalt.err (!%p620_p4)
}
 0x204   :  { %s624_s17 = scalar_lea.hbm %s811_s5, 16 }
 0x205   :  { %p625_p5 = scmp.ne.s32.totalorder %s811_s5, %s624_s17  ;;  %p628_p6 = scmp.lt.u32.totalorder %s624_s17, %s811_s5 }
 0x207   :  { %p630_p7 = pnand %p628_p6, %p625_p5 }
 0x209   :  { %633 = shalt.err (!%p630_p7)
}
 0x20a   :  { %409 = dma.vmem_to_hbm [thread:$0]  %s407_s13, 16, %s811_s5, [#allocation4]  }
 0x20b   :  { %634 = dma.done.wait [#allocation4], 16  }
 0x20c   :  { %635 = vsyncadd [#allocation4], 4294967280 }
 0x20d   :  { %413 = vsyncpa [#allocation4], 1 }

</bundles_post_ra>
